<compile_context>
chip_gen: v7x
topology: tpu7x:2x2x1
jax: 0.10.0
libtpu: 0.0.40
codegen_flags: <defaults>
</compile_context>

<pallas_src>
import jax
import jax.numpy as jnp
import numpy as np
from jax.experimental import pallas as pl
from jax.experimental.pallas import tpu as pltpu


def _concat_kernel(prefix_ref, part_ref, suffix_ref, out_ref):
    """Builds the whole (num_parts, P+1+S, D) output in one shot.

    prefix_ref : (1, P, D)           -- shared prefix tokens
    part_ref   : (num_parts, 1, D)   -- all learned part vectors
    suffix_ref : (1, S, D)           -- shared suffix tokens
    out_ref    : (num_parts, P+1+S, D)
    """
    num_parts = out_ref.shape[0]
    out_dtype = out_ref.dtype

    prefix = prefix_ref[0].astype(out_dtype)         # (P, D)
    suffix = suffix_ref[0].astype(out_dtype)         # (S, D)
    parts = part_ref[...].astype(out_dtype)          # (num_parts, 1, D)

    # Broadcast the shared prefix/suffix across parts (hoisted, done once).
    pre_b = jnp.broadcast_to(prefix[None, :, :], (num_parts,) + prefix.shape)
    suf_b = jnp.broadcast_to(suffix[None, :, :], (num_parts,) + suffix.shape)

    # One full-block, lane/sublane-dense store (no masked partial writes).
    out_ref[...] = jnp.concatenate([pre_b, parts, suf_b], axis=1)


def prompt_learner_part_forward(part_list, token_prefix, token_suffix):
    """Pallas implementation of PromptLearner_part.forward.

    Args:
      part_list    : (num_parts, 1, D)
      token_prefix : (1, P, D)
      token_suffix : (1, S, D)
    Returns:
      (num_parts, 1, P + 1 + S, D)  -- matching torch.stack(prompts, dim=0)
    """
    num_parts, _, dim = part_list.shape
    pre_len = token_prefix.shape[1]
    suf_len = token_suffix.shape[1]
    seq = pre_len + 1 + suf_len
    out_dtype = part_list.dtype

    out = pl.pallas_call(
        _concat_kernel,
        out_shape=jax.ShapeDtypeStruct((num_parts, seq, dim), out_dtype),
        # No grid: everything (a few KiB) lives in VMEM for one kernel step.
        in_specs=[
            pl.BlockSpec(memory_space=pltpu.MemorySpace.VMEM),  # prefix
            pl.BlockSpec(memory_space=pltpu.MemorySpace.VMEM),  # part_list
            pl.BlockSpec(memory_space=pltpu.MemorySpace.VMEM),  # suffix
        ],
        out_specs=pl.BlockSpec(memory_space=pltpu.MemorySpace.VMEM),
    )(token_prefix, part_list, token_suffix)

    # Re-insert the singleton batch dim from the PyTorch prompts: (N, 1, seq, D).
    # (A trivially cheap metadata reshape on a tiny tensor; keeping the kernel
    #  output rank-3 keeps the store a simple dense 2-D-tiled write.)
    return out[:, None, :, :]


if __name__ == "__main__":
    # Small, TPU-friendly shapes consistent with the module's structure:
    #   pre_ctx = 3  -> prefix length 4
    #   total tokenized length = 8 -> suffix length 8 - (pre_ctx + 2) = 3
    #   embedding dim D = 128, num_parts = 2
    key = jax.random.PRNGKey(0)
    k_emb, k_tok, k_part = jax.random.split(key, 3)

    dtype = jnp.float32
    pre_ctx = 3
    total_tokens = 8
    dim = 128
    num_parts = 2
    vocab = 32

    # Deterministic stand-in for clip.tokenize + token_embedding (glue, __init__ only).
    # TODO(synk): clip.tokenize / the CLIP token_embedding module are external; modeled
    # here with a random embedding table + random token ids.
    token_embedding = (0.02 * jax.random.normal(k_emb, (vocab, dim))).astype(dtype)
    tokenized_prompts = jax.random.randint(k_tok, (1, total_tokens), 0, vocab)
    embedding = token_embedding[tokenized_prompts]          # (1, 8, 128)

    token_prefix = embedding[:, :pre_ctx + 1, :]             # (1, 4, 128)
    token_suffix = embedding[:, pre_ctx + 1 + 1:, :]         # (1, 3, 128)

    # nn.init.normal_(part_list, std=0.02)
    part_list = (0.02 * jax.random.normal(k_part, (num_parts, 1, dim))).astype(dtype)

    prompts = prompt_learner_part_forward(part_list, token_prefix, token_suffix)
    prompts = jax.block_until_ready(prompts)

    # Pure-JAX reference (same as the PyTorch loop of cat + stack).
    ref = jnp.stack(
        [jnp.concatenate([token_prefix, part_list[i:i + 1], token_suffix], axis=1)
         for i in range(num_parts)],
        axis=0,
    )

    assert prompts.shape == (num_parts, 1, pre_ctx + 1 + 1 + token_suffix.shape[1], dim)
    np.testing.assert_allclose(np.asarray(prompts), np.asarray(ref), rtol=0, atol=0)
    print("KERNEL_OK")
</pallas_src>

<mosaic_0001>
module attributes {stable_mosaic.version = 11 : i64} {
  func.func @_concat_kernel(%arg0: memref<1x4x128xf32, #tpu.memory_space<vmem>>, %arg1: memref<2x1x128xf32, #tpu.memory_space<vmem>>, %arg2: memref<1x3x128xf32, #tpu.memory_space<vmem>>, %arg3: memref<2x8x128xf32, #tpu.memory_space<vmem>>) attributes {dimension_semantics = [], scalar_prefetch = 0 : i64, scratch_operands = 0 : i64, tpu.core_type = #tpu.core_type<tc>} {
    %c0 = arith.constant 0 : index
    %c0_0 = arith.constant 0 : index
    %c0_1 = arith.constant 0 : index
    %0 = vector.load %arg0[%c0, %c0_0, %c0_1] : memref<1x4x128xf32, #tpu.memory_space<vmem>>, vector<1x4x128xf32>
    %1 = vector.shape_cast %0 : vector<1x4x128xf32> to vector<4x128xf32>
    %c0_2 = arith.constant 0 : index
    %c0_3 = arith.constant 0 : index
    %c0_4 = arith.constant 0 : index
    %2 = vector.load %arg2[%c0_2, %c0_3, %c0_4] : memref<1x3x128xf32, #tpu.memory_space<vmem>>, vector<1x3x128xf32>
    %3 = vector.shape_cast %2 : vector<1x3x128xf32> to vector<3x128xf32>
    %c0_5 = arith.constant 0 : index
    %c0_6 = arith.constant 0 : index
    %c0_7 = arith.constant 0 : index
    %4 = vector.load %arg1[%c0_5, %c0_6, %c0_7] : memref<2x1x128xf32, #tpu.memory_space<vmem>>, vector<2x1x128xf32>
    %5 = vector.shape_cast %1 : vector<4x128xf32> to vector<1x4x128xf32>
    %6 = vector.shape_cast %5 : vector<1x4x128xf32> to vector<1x4x128xf32>
    %7 = vector.broadcast %6 : vector<1x4x128xf32> to vector<2x4x128xf32>
    %8 = vector.shape_cast %3 : vector<3x128xf32> to vector<1x3x128xf32>
    %9 = vector.shape_cast %8 : vector<1x3x128xf32> to vector<1x3x128xf32>
    %10 = vector.broadcast %9 : vector<1x3x128xf32> to vector<2x3x128xf32>
    %11 = tpu.concatenate %7, %4, %10 in 1 : vector<2x4x128xf32>, vector<2x1x128xf32>, vector<2x3x128xf32> -> vector<2x8x128xf32>
    %c0_8 = arith.constant 0 : index
    %c0_9 = arith.constant 0 : index
    %c0_10 = arith.constant 0 : index
    %12 = vector.load %arg3[%c0_8, %c0_9, %c0_10] : memref<2x8x128xf32, #tpu.memory_space<vmem>>, vector<2x8x128xf32>
    tpu.vector_store %arg3[%c0_8, %c0_9, %c0_10], %11 {strides = array<i32>} : memref<2x8x128xf32, #tpu.memory_space<vmem>>, vector<2x8x128xf32>,
    return
  }
}

</mosaic_0001>

<bundles_post_ra>
// kernel: tpu_custom_call.1
= control target key start
LH: loop header
LB: loop body
LE: loop exit
PB: predicated region body
PF: predicated region fallthrough
CT: control target
= control target key end

     0   :  { %vm34_vm0 = vcmask 1043456   ;;  %vm37_vm1 = vcmask 1044480   ;;  %s134_s0 = inlined_call_operand.vmem [shape: f32[1,4,128], index: 0, kind: input, shape index: {}]   ;;  %s135_s1 = inlined_call_operand.vmem [shape: f32[2,1,128], index: 1, kind: input, shape index: {}]   ;;  %s136_s2 = inlined_call_operand.vmem [shape: f32[1,3,128], index: 2, kind: input, shape index: {}]   ;;  %s137_s3 = inlined_call_operand.hbm [shape: f32[2,8,128], index: 3, kind: output, shape index: {}]  }
   0x1   :  { %v15_v0 = vld [vmem:[%s134_s0] sm:$0xf] }
   0x2   :  { %v16_v1 = vld [vmem:[%s136_s2] sm:$0x7] }
   0x3   :  { %v58_v2 = vld [vmem:[%s135_s1] ss:$0 sm:$0xff]  ;;  %v32_v3 = vrot.slane %v16_v1, 3  ;;  %v59_v4 = vld [vmem:[%s135_s1 + $0x1] ss:$0 sm:$0xff] }
   0x4   :  { %v35_v5 = vsel %vm34_vm0, %v15_v0, %v58_v2  ;;  %v36_v6 = vsel %vm34_vm0, %v15_v0, %v59_v4 }
   0x5   :  { %8 = vsyncpa [#allocation3], 0  ;;  %s87_s20 = smov [#allocation2]   ;;  %v38_v7 = vsel %vm37_vm1, %v35_v5, %v32_v3  ;;  %v39_v8 = vsel %vm37_vm1, %v36_v6, %v32_v3 }
   0x6   :  { %s47_s0 = sshll.u32 %s87_s20, 4  ;;  %40 = vst [vmem:[#allocation2] sm:$0xff] %v38_v7  ;;  %41 = vst [vmem:[#allocation2 + $0x8] sm:$0xff] %v39_v8  ;;  %s48_s0 = int_to_ptr.vmem [resolvable:$true] %s47_s0 }
   0x7   :  { %s63_s2 = scalar_lea.vmem %s48_s0, 256  ;;  %p68_p1 = scmp.lt.s32.totalorder %s48_s0, %s48_s0 }
   0x8   :  { %p64_p0 = scmp.ne.s32.totalorder %s48_s0, %s63_s2  ;;  %p69_p2 = scmp.lt.s32.totalorder %s63_s2, %s63_s2 }
   0xa   :  { %p70_p3 = por %p69_p2, %p68_p1 }
   0xc   :  { %p71_p4 = pnand %p70_p3, %p64_p0 }
   0xe   :  { %74 = shalt.err (!%p71_p4)
}
   0xf   :  { %s75_s1 = scalar_lea.hbm %s137_s3, 256 }
  0x10   :  { %p76_p5 = scmp.ne.s32.totalorder %s137_s3, %s75_s1  ;;  %p79_p6 = scmp.lt.u32.totalorder %s75_s1, %s137_s3 }
  0x12   :  { %p81_p7 = pnand %p79_p6, %p76_p5 }
  0x14   :  { %84 = shalt.err (!%p81_p7)
}
  0x15   :  { %s88_s27 = smov 128   ;;  %s89_s28 = smov 8  }
  0x16   :  { %53 = dma.vmem_to_hbm [thread:$0]  %s48_s0, 256, %s137_s3, [#allocation3], %s88_s27, %s88_s27, %s89_s28  }
  0x17   :  { %85 = dma.done.wait [#allocation3], 256  }
  0x18   :  { %86 = vsyncadd [#allocation3], 4294967040 }
  0x19   :  { %57 = vsyncpa [#allocation3], 1 }

</bundles_post_ra>
